<compile_context>
chip_gen: v7x
topology: tpu7x:2x2x1
jax: 0.10.0
libtpu: 0.0.40
codegen_flags: <defaults>
</compile_context>

<pallas_src>
import jax
import jax.numpy as jnp
from jax import lax
from jax.experimental import pallas as pl
from jax.experimental.pallas import tpu as pltpu


def _round_up(x: int, m: int) -> int:
    return ((x + m - 1) // m) * m


def _choose_tiles(U: int, I: int, tile_u: int, tile_i: int):
    """Pick (tU, U_pad, tI, I_pad).

    U rides the sublane axis of the user operand (granule 16 covers both f32
    and bf16 packing); I rides the lane axis of the output (granule 128 for
    unmasked full-width stores). If the grid would collapse to (1, 1), split
    the larger axis in two so both TensorCores get work (v7x / megacore).
    """
    tile_u = max(_round_up(tile_u, 16), 16)
    tile_i = max(_round_up(tile_i, 128), 128)

    if I <= tile_i:
        I_pad = _round_up(max(I, 1), 128)
        tI = I_pad
    else:
        tI = tile_i
        I_pad = _round_up(I, tI)

    if U <= tile_u:
        U_pad = _round_up(max(U, 1), 16)
        tU = U_pad
    else:
        tU = tile_u
        U_pad = _round_up(U, tU)

    # Guarantee >= 2 grid steps along a "parallel" axis when possible.
    if (U_pad // tU == 1) and (I_pad // tI == 1):
        if I_pad >= 256:
            I_pad = _round_up(I_pad, 256)
            tI = I_pad // 2
        elif U_pad >= 32:
            U_pad = _round_up(U_pad, 32)
            tU = U_pad // 2

    return tU, U_pad, tI, I_pad


def mf_scores_kernel(u_ref, it_ref, o_ref):
    # u_ref : (tU, H) selected-user tile
    # it_ref: (tI, H) selected-item tile (row-major; no wrapper-side transpose)
    # o_ref : (tU, tI) pairwise dot products (lane-dense store)
    # Contract H of both operands on the MXU; the RHS transpose happens
    # in-kernel on the idle XLU. f32 accumulation always.
    o_ref[...] = lax.dot_general(
        u_ref[...],
        it_ref[...],
        dimension_numbers=(((1,), (1,)), ((), ())),
        preferred_element_type=jnp.float32,
    ).astype(o_ref.dtype)


def mf_forward(
    user_table,
    item_table,
    user_ids,
    item_ids,
    *,
    tile_u: int = 512,
    tile_i: int = 1024,
    compute_dtype=jnp.float32,
    out_dtype=jnp.float32,
    min_pallas_elements: int = 16384,
):
    """Pallas implementation of MFModel.forward(user_ids, item_ids).

    Returns a (len(user_ids), len(item_ids)) matrix; entry [r, c] is
    dot(user_hiddens[user_ids[r]], item_hiddens[item_ids[c]]).

    Defaults reproduce the PyTorch f32 torch.dot math (f32 operands, f32
    accumulation, f32 output). Pass compute_dtype/out_dtype=jnp.bfloat16 to
    halve operand / output HBM traffic when the rounding is acceptable.
    tile_u/tile_i are deliberately large (output tile ~2 MB); the kernel is
    writeback/per-step-overhead bound, so bigger tiles help on every TPU
    generation — re-check VMEM (v7x: 64 MiB physical) before pushing past
    ~8 MB output tiles.
    """
    H = int(user_table.shape[1])
    U = int(user_ids.shape[0])
    I = int(item_ids.shape[0])
    user_ids = user_ids.astype(jnp.int32)
    item_ids = item_ids.astype(jnp.int32)

    # --- Small-problem fast path: one plain XLA dot beats padding + launch ---
    if U * I < min_pallas_elements:
        u_sel = jnp.take(user_table, user_ids, axis=0).astype(compute_dtype)
        i_sel = jnp.take(item_table, item_ids, axis=0).astype(compute_dtype)
        out = jnp.dot(
            u_sel,
            i_sel.T,
            preferred_element_type=jnp.float32,
            precision=lax.Precision.HIGHEST,
        )
        return out.astype(out_dtype)

    tU, U_pad, tI, I_pad = _choose_tiles(U, I, tile_u, tile_i)

    # --- Gather the selected rows first, then cast (touches only U_pad/I_pad
    #     rows, never the whole tables). Padded ids use row 0 (always valid);
    #     padded outputs are sliced off below. No transpose here.
    uid = jnp.pad(user_ids, (0, U_pad - U))
    iid = jnp.pad(item_ids, (0, I_pad - I))
    u_sel = jnp.take(user_table, uid, axis=0).astype(compute_dtype)   # (U_pad, H)
    i_sel = jnp.take(item_table, iid, axis=0).astype(compute_dtype)   # (I_pad, H)

    grid = (U_pad // tU, I_pad // tI)

    esize = jnp.dtype(compute_dtype).itemsize
    osize = jnp.dtype(out_dtype).itemsize
    # Double-buffered residency estimate; only pin the scoped-VMEM limit when
    # the defaults would not obviously cover it (big custom tiles).
    resident_bytes = 2 * (tU * tI * osize + tU * H * esize + tI * H * esize)
    vmem_limit = None
    if resident_bytes > 12 * 2**20:
        vmem_limit = min(resident_bytes + 8 * 2**20, 56 * 2**20)

    out_padded = pl.pallas_call(
        mf_scores_kernel,
        out_shape=jax.ShapeDtypeStruct((U_pad, I_pad), out_dtype),
        grid_spec=pltpu.PrefetchScalarGridSpec(
            num_scalar_prefetch=0,
            grid=grid,
            in_specs=[
                pl.BlockSpec((tU, H), lambda i, j: (i, 0)),   # user tile
                pl.BlockSpec((tI, H), lambda i, j: (j, 0)),   # item tile (N, K)
            ],
            out_specs=pl.BlockSpec((tU, tI), lambda i, j: (i, j)),
        ),
        compiler_params=pltpu.CompilerParams(
            # Independent output tiles on both axes -> megacore / dual-TC.
            dimension_semantics=("parallel", "parallel"),
            vmem_limit_bytes=vmem_limit,
        ),
        cost_estimate=pl.CostEstimate(
            flops=2 * U_pad * I_pad * H,
            transcendentals=0,
            bytes_accessed=(
                U_pad * H * esize
                + (U_pad // tU) * I_pad * H * esize
                + U_pad * I_pad * osize
            ),
        ),
    )(u_sel, i_sel)

    # Drop the padding to recover the exact PyTorch output shape.
    return out_padded[:U, :I]


if __name__ == "__main__":
    # Deterministic "parameters" mirroring __init__:
    #   user_hiddens: N vectors of shape (hidden_dim,)  ~ U[0,1)  (torch.rand)
    #   item_hiddens: M vectors of shape (hidden_dim,)  ~ U[0,1)
    N, M, hidden_dim = 300, 350, 32
    key = jax.random.PRNGKey(0)
    k_user, k_item, k_uid, k_iid = jax.random.split(key, 4)
    user_table = jax.random.uniform(k_user, (N, hidden_dim), dtype=jnp.float32)
    item_table = jax.random.uniform(k_item, (M, hidden_dim), dtype=jnp.float32)

    # (a) Id batch large enough to exercise the Pallas path (U*I >= 16384).
    user_ids = jax.random.randint(k_uid, (160,), 0, N, dtype=jnp.int32)
    item_ids = jax.random.randint(k_iid, (192,), 0, M, dtype=jnp.int32)
    out = mf_forward(user_table, item_table, user_ids, item_ids)
    out = jax.block_until_ready(out)

    ref = jnp.dot(
        jnp.take(user_table, user_ids, axis=0),
        jnp.take(item_table, item_ids, axis=0).T,
        precision=lax.Precision.HIGHEST,
    )
    assert out.shape == (user_ids.shape[0], item_ids.shape[0])
    assert jnp.allclose(out, ref, atol=1e-2, rtol=1e-2)

    # (b) Tiny id batch -> small-problem fast path (plain XLA dot).
    su = jnp.array([0, 3, 5, 7, 2, 9, 11, 4], dtype=jnp.int32)
    si = jnp.array([1, 2, 0, 8, 9, 3, 6, 5], dtype=jnp.int32)
    out_small = jax.block_until_ready(
        mf_forward(user_table, item_table, su, si)
    )
    ref_small = jnp.dot(
        jnp.take(user_table, su, axis=0),
        jnp.take(item_table, si, axis=0).T,
        precision=lax.Precision.HIGHEST,
    )
    assert out_small.shape == (su.shape[0], si.shape[0])
    assert jnp.allclose(out_small, ref_small, atol=1e-4, rtol=1e-4)

    print("KERNEL_OK")
</pallas_src>

<mosaic_0001>
module attributes {stable_mosaic.version = 11 : i64} {
  func.func @mf_scores_kernel(%arg0: i32, %arg1: i32, %arg2: memref<160x32xf32, #tpu.memory_space<vmem>>, %arg3: memref<128x32xf32, #tpu.memory_space<vmem>>, %arg4: memref<160x128xf32, #tpu.memory_space<vmem>>) attributes {dimension_semantics = [#tpu.dimension_semantics<parallel>, #tpu.dimension_semantics<parallel>], iteration_bounds = array<i64: 1, 2>, scalar_prefetch = 0 : i64, scratch_operands = 0 : i64, tpu.core_type = #tpu.core_type<tc>, window_params = [{transform_indices = @transform_0, window_bounds = array<i64: 160, 32>}, {transform_indices = @transform_1, window_bounds = array<i64: 128, 32>}, {transform_indices = @transform_2, window_bounds = array<i64: 160, 128>}]} {
    %c0 = arith.constant 0 : index
    %c0_0 = arith.constant 0 : index
    %0 = vector.load %arg2[%c0, %c0_0] : memref<160x32xf32, #tpu.memory_space<vmem>>, vector<160x32xf32>
    %c0_1 = arith.constant 0 : index
    %c0_2 = arith.constant 0 : index
    %1 = vector.load %arg3[%c0_1, %c0_2] : memref<128x32xf32, #tpu.memory_space<vmem>>, vector<128x32xf32>
    %cst = arith.constant dense<0.000000e+00> : vector<160x128xf32>
    %2 = tpu.matmul %0, %1, %cst {dimension_numbers = #tpu.dot_dimension_numbers<[1], [1], [0], [0], [0, 0, 1, 0], [], []>} : vector<160x32xf32>, vector<128x32xf32>, vector<160x128xf32> -> vector<160x128xf32>
    %c0_3 = arith.constant 0 : index
    %c0_4 = arith.constant 0 : index
    %3 = vector.load %arg4[%c0_3, %c0_4] : memref<160x128xf32, #tpu.memory_space<vmem>>, vector<160x128xf32>
    tpu.vector_store %arg4[%c0_3, %c0_4], %2 {strides = array<i32>} : memref<160x128xf32, #tpu.memory_space<vmem>>, vector<160x128xf32>,
    return
  }
  func.func @transform_0(%arg0: i32, %arg1: i32) -> (i32, i32) {
    %c0_i32 = arith.constant 0 : i32
    %c0_i32_0 = arith.constant 0 : i32
    return %arg0, %c0_i32 : i32, i32
  }
  func.func @transform_1(%arg0: i32, %arg1: i32) -> (i32, i32) {
    %c0_i32 = arith.constant 0 : i32
    %c0_i32_0 = arith.constant 0 : i32
    return %arg1, %c0_i32 : i32, i32
  }
  func.func @transform_2(%arg0: i32, %arg1: i32) -> (i32, i32) {
    %c0_i32 = arith.constant 0 : i32
    return %arg0, %arg1 : i32, i32
  }
}

</mosaic_0001>

<bundles_post_ra>
// kernel: tpu_custom_call.1
= control target key start
LH: loop header
LB: loop body
LE: loop exit
PB: predicated region body
PF: predicated region fallthrough
CT: control target
= control target key end

     0   :  { %7 = vsyncpa [#allocation3], 0  ;;  %s1290_s0 = inlined_call_operand.vmem [shape: f32[160,32], index: 0, kind: input, shape index: {}]   ;;  %s1291_s1 = inlined_call_operand.vmem [shape: f32[256,32], index: 1, kind: input, shape index: {}]   ;;  %s1292_s2 = inlined_call_operand.hbm [shape: f32[160,256], index: 2, kind: output, shape index: {}]  }
   0x1   :  { %9 = vsyncpa [#allocation3 + $0x1], 0  ;;  %s981_s9 = smov 0   ;;  %s983_s10 = smov 0  }
   0x2   :  { %s985_s11 = smov 0   ;;  %s987_s12 = smov 0  }
   0x3   :  { %s989_s13 = smov 0   ;;  %s991_s14 = smov 0  }
   0x4 LB: > { %s614_s15 = sadd.s32 4294967295, %s960_s14   ;;  %s615_s16 = sadd.s32 4294967294, %s960_s14   ;;  %s960_s14 = sphi %s991_s14, %s15_s14   ;;  %s956_s13 = sphi %s989_s13, %s1301_s13   ;;  %s952_s12 = sphi %s987_s12, %s1300_s12   ;;  %s948_s11 = sphi %s985_s11, %s1299_s11   ;;  %s944_s10 = sphi %s983_s10, %s1298_s10   ;;  %s940_s9 = sphi %s981_s9, %s1297_s9  }
   0x5   : > { %s24_s17 = sadd.s32 1, %s956_s13  ;;  %s88_s18 = sadd.s32 1, %s948_s11 }
   0x6   : > { %p25_p0 = scmp.ge.s32.totalorder %s24_s17, 2  ;;  %p98_p1 = scmp.ne.s32.totalorder %s948_s11, %s944_s10 }
   0x7   : > { %p99_p2 = scmp.eq.s32.totalorder %s614_s15, 1  ;;  %p104_p3 = scmp.ne.s32.totalorder %s944_s10, %s940_s9 }
   0x8   : > { %s1303_s17 = smov (%p25_p0, %s24_s17), 0  ;;  %p105_p5 = scmp.eq.s32.totalorder %s615_s16, 1 }
   0x9   : > { %p1021_p4 = por %p99_p2, %p98_p1  ;;  %s84_s20 = ssub.s32 %s956_s13, %s1303_s17 }
   0xa   : > { %p619_p6 = scmp.ge.s32.totalorder %s960_s14, 1  ;;  %p86_p7 = scmp.eq.s32.totalorder %s84_s20, 0 }
   0xb   : > { %p1028_p8 = por %p105_p5, %p104_p3  ;;  %p141_p9 = scmp.lt.s32.totalorder %s960_s14, 3 }
   0xc   : > { %s1034_s22 = scalar_select %p86_p7, %s948_s11, %s88_s18  }
   0xd   : > { %p142_p10 = pnand %p619_p6, %p141_p9 }
   0xe   : > { %s620_s23 = sshll.u32 (!%p142_p10), %s952_s12, 4  ;;  %vm217_vm0 = vcmask (!%p142_p10), 261120   ;;  %v181_v0 = vld [vmem:[%s1290_s0] sm:$0xff] (!%p142_p10)  ;;  %v191_v1 = vld [vmem:[%s1290_s0 + $0x50] sm:$0xff] (!%p142_p10)  ;;  %v182_v27 = vld [vmem:[%s1290_s0 + $0x8] sm:$0xff] (!%p142_p10)  ;;  %s165_s4 = sand.u32 (!%p142_p10), 1, %s944_s10  }
   0xf   : > { %145 = sbr.rel (%p142_p10) target bundleno = 337 (0x151), region = 28  ;;  %p175_p11 = scmp.lt.s32.totalorder (!%p142_p10), %s620_s23, 31  ;;  %729 = vmatprep.mubr.msk.f32.mxu0 (!%p142_p10), %vm217_vm0, %v181_v0  ;;  %744 = vmatprep.mubr.msk.f32.mxu1 (!%p142_p10), %vm217_vm0, %v191_v1  ;;  %vm1052_vm1 = vmpackc.low (!%p142_p10), %vm217_vm0, %vm217_vm0  ;;  %v192_v28 = vld [vmem:[%s1290_s0 + $0x58] sm:$0xff] (!%p142_p10)  ;;  %v183_v29 = vld [vmem:[%s1290_s0 + $0x10] sm:$0xff] (!%p142_p10) }
  0x10   : > { %v193_v30 = vld [vmem:[%s1290_s0 + $0x60] sm:$0xff] (!%p142_p10)  ;;  %v184_v31 = vld [vmem:[%s1290_s0 + $0x18] sm:$0xff] (!%p142_p10)  ;;  %v194_v32 = vld [vmem:[%s1290_s0 + $0x68] sm:$0xff] (!%p142_p10)  ;;  %s823_s5 = smul.u32 (!%p142_p10), 160, %s165_s4  ;;  %s658_s7 = sshll.u32 (!%p142_p10), %s952_s12, 7 }
  0x11   : > { %v185_v33 = vld [vmem:[%s1290_s0 + $0x20] sm:$0xff] (!%p142_p10)  ;;  %v195_v34 = vld [vmem:[%s1290_s0 + $0x70] sm:$0xff] (!%p142_p10)  ;;  %v186_v35 = vld [vmem:[%s1290_s0 + $0x28] sm:$0xff] (!%p142_p10)  ;;  %s1234_s18 = scalar_lea.hbm (!%p142_p10), %s1292_s2, %s658_s7  ;;  %s1244_s12 = scalar_lea.sflag (!%p142_p10), [#allocation3], %s165_s4 }
  0x12   : > { %v196_v36 = vld [vmem:[%s1290_s0 + $0x78] sm:$0xff] (!%p142_p10)  ;;  %v187_v37 = vld [vmem:[%s1290_s0 + $0x30] sm:$0xff] (!%p142_p10)  ;;  %v197_v38 = vld [vmem:[%s1290_s0 + $0x80] sm:$0xff] (!%p142_p10)  ;;  %s1211_s6 = scalar_lea.vmem (!%p142_p10), [#allocation2], %s823_s5 }
  0x13   : > { %v188_v39 = vld [vmem:[%s1290_s0 + $0x38] sm:$0xff] (!%p142_p10)  ;;  %v198_v40 = vld [vmem:[%s1290_s0 + $0x88] sm:$0xff] (!%p142_p10)  ;;  %v189_v41 = vld [vmem:[%s1290_s0 + $0x40] sm:$0xff] (!%p142_p10)  ;;  %s527_s8 = sshll.u32 (!%p142_p10), %s1211_s6, 4  ;;  %s1236_s8 = int_to_ptr.vmem [resolvable:$true] %s527_s8 }
  0x14   : > { %v199_v42 = vld [vmem:[%s1290_s0 + $0x90] sm:$0xff] (!%p142_p10)  ;;  %v190_v43 = vld [vmem:[%s1290_s0 + $0x48] sm:$0xff] (!%p142_p10)  ;;  %v200_v44 = vld [vmem:[%s1290_s0 + $0x98] sm:$0xff] (!%p142_p10)  ;;  %s882_s20 = scalar_lea.vmem (!%p142_p10), %s1236_s8, 2560 }
  0x15   : > { %p883_p12 = scmp.ne.s32.totalorder (!%p142_p10), %s1236_s8, %s882_s20 }
  0x16   : > { %s1305_s23 = smov (!%p175_p11, %s620_s23), 31 }
  0x17   : > { %s621_s28 = sshll.u32 %s1305_s23, 3  ;;  %p884_p13 = pnand %p883_p12, %p1021_p4 }
  0x18   : > { %s1048_s3 = scalar_lea.vmem %s1291_s1, %s621_s28  ;;  %s962_s23 = smov [#allocation2]  }
  0x19   : > { %v201_v3 = vld [vmem:[%s1048_s3] sm:$0xff]  ;;  %v202_v4 = vld [vmem:[%s1048_s3 + $0x8] sm:$0xff]  ;;  %v203_v5 = vld [vmem:[%s1048_s3 + $0x10] sm:$0xff]  ;;  %p885_p0 = pneg %p884_p13  ;;  %s886_s24 = sshll.u32 %s962_s23, 4  ;;  %s887_s24 = int_to_ptr.vmem [resolvable:$false] %s886_s24 }
  0x1a   : > { %v759_v6 = vpack.c.bf16 %v202_v4, %v201_v3  ;;  %v204_v7 = vld [vmem:[%s1048_s3 + $0x18] sm:$0xff]  ;;  %v205_v9 = vld [vmem:[%s1048_s3 + $0x20] sm:$0xff]  ;;  %v206_v10 = vld [vmem:[%s1048_s3 + $0x28] sm:$0xff]  ;;  %s888_s25 = scalar_lea.vmem %s887_s24, 5120  ;;  %p889_p1 = scmp.lt.s32.totalorder %s1236_s8, %s887_s24 }
  0x1b   : > { %v765_v8 = vpack.c.bf16 %v204_v7, %v203_v5  ;;  %v771_v11 = vpack.c.bf16 %v206_v10, %v205_v9  ;;  %v207_v12 = vld [vmem:[%s1048_s3 + $0x30] sm:$0xff]  ;;  %v208_v13 = vld [vmem:[%s1048_s3 + $0x38] sm:$0xff]  ;;  %v209_v15 = vld [vmem:[%s1048_s3 + $0x40] sm:$0xff]  ;;  %p890_p2 = scmp.lt.s32.totalorder %s888_s25, %s882_s20 }
  0x1c   : > { %761 = vmatprep.subr.msk.bf16.mxu0 %vm1052_vm1, %v759_v6  ;;  %807 = vmatprep.subr.msk.bf16.mxu1 %vm1052_vm1, %v759_v6  ;;  %v777_v14 = vpack.c.bf16 %v208_v13, %v207_v12  ;;  %v210_v16 = vld [vmem:[%s1048_s3 + $0x48] sm:$0xff]  ;;  %v211_v18 = vld [vmem:[%s1048_s3 + $0x50] sm:$0xff]  ;;  %v212_v19 = vld [vmem:[%s1048_s3 + $0x58] sm:$0xff] }
  0x1d   : > { %764 = vmatpush3.bf16.xpose.msk.msra.mxu0 %vm1052_vm1, %v759_v6  ;;  %815 = vmatpush3.bf16.xpose.msk.msra.mxu1 %vm1052_vm1, %v759_v6  ;;  %v783_v17 = vpack.c.bf16 %v210_v16, %v209_v15  ;;  %v789_v20 = vpack.c.bf16 %v212_v19, %v211_v18  ;;  %v213_v21 = vld [vmem:[%s1048_s3 + $0x60] sm:$0xff]  ;;  %v214_v22 = vld [vmem:[%s1048_s3 + $0x68] sm:$0xff]  ;;  %v215_v24 = vld [vmem:[%s1048_s3 + $0x70] sm:$0xff]  ;;  %p891_p3 = por %p890_p2, %p889_p1 }
  0x1e   : > { %767 = vmatprep.subr.msk.bf16.mxu0 %vm1052_vm1, %v765_v8  ;;  %808 = vmatprep.subr.msk.bf16.mxu1 %vm1052_vm1, %v765_v8  ;;  %v795_v23 = vpack.c.bf16 %v214_v22, %v213_v21  ;;  %v216_v25 = vld [vmem:[%s1048_s3 + $0x78] sm:$0xff] }
  0x1f   : > { %v801_v26 = vpack.c.bf16 %v216_v25, %v215_v24  ;;  %p892_p5 = pnand %p891_p3, %p885_p0 }
  0x25   : > { %770 = vmatpush3.bf16.xpose.msk.msra.mxu0 %vm1052_vm1, %v765_v8  ;;  %816 = vmatpush3.bf16.xpose.msk.msra.mxu1 %vm1052_vm1, %v765_v8 }
  0x26   : > { %773 = vmatprep.subr.msk.bf16.mxu0 %vm1052_vm1, %v771_v11  ;;  %809 = vmatprep.subr.msk.bf16.mxu1 %vm1052_vm1, %v771_v11 }
  0x2d   : > { %776 = vmatpush3.bf16.xpose.msk.msra.mxu0 %vm1052_vm1, %v771_v11  ;;  %817 = vmatpush3.bf16.xpose.msk.msra.mxu1 %vm1052_vm1, %v771_v11 }
  0x2e   : > { %779 = vmatprep.subr.msk.bf16.mxu0 %vm1052_vm1, %v777_v14  ;;  %810 = vmatprep.subr.msk.bf16.mxu1 %vm1052_vm1, %v777_v14 }
  0x35   : > { %782 = vmatpush3.bf16.xpose.msk.msra.mxu0 %vm1052_vm1, %v777_v14  ;;  %818 = vmatpush3.bf16.xpose.msk.msra.mxu1 %vm1052_vm1, %v777_v14 }
  0x36   : > { %785 = vmatprep.subr.msk.bf16.mxu0 %vm1052_vm1, %v783_v17  ;;  %811 = vmatprep.subr.msk.bf16.mxu1 %vm1052_vm1, %v783_v17 }
  0x3d   : > { %788 = vmatpush3.bf16.xpose.msk.msra.mxu0 %vm1052_vm1, %v783_v17  ;;  %819 = vmatpush3.bf16.xpose.msk.msra.mxu1 %vm1052_vm1, %v783_v17 }
  0x3e   : > { %791 = vmatprep.subr.msk.bf16.mxu0 %vm1052_vm1, %v789_v20  ;;  %812 = vmatprep.subr.msk.bf16.mxu1 %vm1052_vm1, %v789_v20 }
  0x45   : > { %794 = vmatpush3.bf16.xpose.msk.msra.mxu0 %vm1052_vm1, %v789_v20  ;;  %820 = vmatpush3.bf16.xpose.msk.msra.mxu1 %vm1052_vm1, %v789_v20 }
  0x46   : > { %797 = vmatprep.subr.msk.bf16.mxu0 %vm1052_vm1, %v795_v23  ;;  %813 = vmatprep.subr.msk.bf16.mxu1 %vm1052_vm1, %v795_v23 }
  0x4d   : > { %800 = vmatpush3.bf16.xpose.msk.msra.mxu0 %vm1052_vm1, %v795_v23  ;;  %821 = vmatpush3.bf16.xpose.msk.msra.mxu1 %vm1052_vm1, %v795_v23 }
  0x4e   : > { %803 = vmatprep.subr.msk.bf16.mxu0 %vm1052_vm1, %v801_v26  ;;  %814 = vmatprep.subr.msk.bf16.mxu1 %vm1052_vm1, %v801_v26 }
  0x55   : > { %806 = vmatpush3.bf16.xpose.msk.msra.mxu0 %vm1052_vm1, %v801_v26  ;;  %822 = vmatpush3.bf16.xpose.msk.msra.mxu1 %vm1052_vm1, %v801_v26 }
  0x5c   : > { %730 = vmatmul.mubr.msk.f32.vlgmr.msra.gmra.mrb[0].mxu0 %vm217_vm0, %v182_v27  ;;  %745 = vmatmul.mubr.msk.f32.vlgmr.msra.gmra.mrb[0].mxu1 %vm217_vm0, %v192_v28 }
  0x5d   : > { %732 = vmatprep.mubr.msk.f32.mxu0 %vm217_vm0, %v183_v29  ;;  %747 = vmatprep.mubr.msk.f32.mxu1 %vm217_vm0, %v193_v30 }
  0x60   : > { %733 = vmatmul.mubr.msk.f32.gmra.mrb[2].mxu0 %vm217_vm0, %v184_v31  ;;  %748 = vmatmul.mubr.msk.f32.gmra.mrb[2].mxu1 %vm217_vm0, %v194_v32 }
  0x61   : > { %735 = vmatprep.mubr.msk.f32.mxu0 %vm217_vm0, %v185_v33  ;;  %750 = vmatprep.mubr.msk.f32.mxu1 %vm217_vm0, %v195_v34 }
  0x64   : > { %736 = vmatmul.mubr.msk.f32.gmra.mrb[4].mxu0 %vm217_vm0, %v186_v35  ;;  %751 = vmatmul.mubr.msk.f32.gmra.mrb[4].mxu1 %vm217_vm0, %v196_v36 }
  0x65   : > { %738 = vmatprep.mubr.msk.f32.mxu0 %vm217_vm0, %v187_v37  ;;  %753 = vmatprep.mubr.msk.f32.mxu1 %vm217_vm0, %v197_v38 }
  0x68   : > { %739 = vmatmul.mubr.msk.f32.gmra.mrb[6].mxu0 %vm217_vm0, %v188_v39  ;;  %754 = vmatmul.mubr.msk.f32.gmra.mrb[6].mxu1 %vm217_vm0, %v198_v40 }
  0x69   : > { %741 = vmatprep.mubr.msk.f32.mxu0 %vm217_vm0, %v189_v41  ;;  %756 = vmatprep.mubr.msk.f32.mxu1 %vm217_vm0, %v199_v42 }
  0x6c   : > { %742 = vmatmul.mubr.msk.f32.gmra.mrb[8].mxu0 %vm217_vm0, %v190_v43  ;;  %757 = vmatmul.mubr.msk.f32.gmra.mrb[8].mxu1 %vm217_vm0, %v200_v44 }
 0x12f   : > { %v731_v45 = vpop.f32.mrb[0].mxu0  ;;  %v746_v46 = vpop.f32.mrb[0].mxu1 }
 0x130   : > { %492 = vst [vmem:[%s1211_s6 + $0x8] sm:$0xff] %v731_v45  ;;  %502 = vst [vmem:[%s1211_s6 + $0x58] sm:$0xff] %v746_v46  ;;  %v392_v47 = vpop.f32.mrb[1].mxu0  ;;  %v442_v48 = vpop.f32.mrb[1].mxu1 }
 0x131   : > { %491 = vst [vmem:[%s1211_s6] sm:$0xff] %v392_v47  ;;  %501 = vst [vmem:[%s1211_s6 + $0x50] sm:$0xff] %v442_v48 }
 0x133   : > { %v734_v49 = vpop.f32.mrb[2].mxu0  ;;  %v749_v50 = vpop.f32.mrb[2].mxu1 }
 0x134   : > { %494 = vst [vmem:[%s1211_s6 + $0x18] sm:$0xff] %v734_v49  ;;  %504 = vst [vmem:[%s1211_s6 + $0x68] sm:$0xff] %v749_v50  ;;  %v402_v51 = vpop.f32.mrb[3].mxu0  ;;  %v452_v52 = vpop.f32.mrb[3].mxu1 }
 0x135   : > { %493 = vst [vmem:[%s1211_s6 + $0x10] sm:$0xff] %v402_v51  ;;  %503 = vst [vmem:[%s1211_s6 + $0x60] sm:$0xff] %v452_v52 }
 0x137   : > { %v737_v53 = vpop.f32.mrb[4].mxu0  ;;  %v752_v54 = vpop.f32.mrb[4].mxu1 }
 0x138   : > { %496 = vst [vmem:[%s1211_s6 + $0x28] sm:$0xff] %v737_v53  ;;  %506 = vst [vmem:[%s1211_s6 + $0x78] sm:$0xff] %v752_v54  ;;  %v412_v55 = vpop.f32.mrb[5].mxu0  ;;  %v462_v56 = vpop.f32.mrb[5].mxu1 }
 0x139   : > { %495 = vst [vmem:[%s1211_s6 + $0x20] sm:$0xff] %v412_v55  ;;  %505 = vst [vmem:[%s1211_s6 + $0x70] sm:$0xff] %v462_v56 }
 0x13b   : > { %v740_v57 = vpop.f32.mrb[6].mxu0  ;;  %v755_v58 = vpop.f32.mrb[6].mxu1 }
 0x13c   : > { %498 = vst [vmem:[%s1211_s6 + $0x38] sm:$0xff] %v740_v57  ;;  %508 = vst [vmem:[%s1211_s6 + $0x88] sm:$0xff] %v755_v58  ;;  %v422_v59 = vpop.f32.mrb[7].mxu0  ;;  %v472_v60 = vpop.f32.mrb[7].mxu1 }
 0x13d   : > { %497 = vst [vmem:[%s1211_s6 + $0x30] sm:$0xff] %v422_v59  ;;  %507 = vst [vmem:[%s1211_s6 + $0x80] sm:$0xff] %v472_v60 }
 0x13f   : > { %v743_v61 = vpop.f32.mrb[8].mxu0  ;;  %v758_v62 = vpop.f32.mrb[8].mxu1 }
 0x140   : > { %500 = vst [vmem:[%s1211_s6 + $0x48] sm:$0xff] %v743_v61  ;;  %510 = vst [vmem:[%s1211_s6 + $0x98] sm:$0xff] %v758_v62  ;;  %v432_v63 = vpop.f32.mrb[9].mxu0  ;;  %v482_v0 = vpop.f32.mrb[9].mxu1 }
 0x141   : > { %499 = vst [vmem:[%s1211_s6 + $0x40] sm:$0xff] %v432_v63  ;;  %509 = vst [vmem:[%s1211_s6 + $0x90] sm:$0xff] %v482_v0 }
 0x142   : > { %895 = shalt.err (!%p892_p5)
}
 0x143   : > { %s896_s26 = scalar_lea.hbm %s1234_s18, 2560  ;;  %s900_s29 = scalar_lea.hbm %s1292_s2, 5120 }
 0x144   : > { %p897_p6 = scmp.ne.s32.totalorder %s1234_s18, %s896_s26  ;;  %p901_p10 = scmp.lt.u32.totalorder %s1234_s18, %s1292_s2 }
 0x145   : > { %p902_p11 = scmp.lt.u32.totalorder %s900_s29, %s896_s26  ;;  %p904_p13 = scmp.lt.u32.totalorder %s896_s26, %s1234_s18 }
 0x146   : > { %p898_p7 = pnand %p897_p6, %p1021_p4 }
 0x147   : > { %p903_p12 = por %p902_p11, %p901_p10 }
 0x148   : > { %p899_p9 = pneg %p898_p7 }
 0x149   : > { %p905_p0 = por %p904_p13, %p903_p12 }
 0x14b   : > { %p906_p1 = pnand %p905_p0, %p899_p9 }
 0x14d   : > { %909 = shalt.err (!%p906_p1)
}
 0x14e   : > { %s963_s4 = smov 128   ;;  %s964_s5 = smov 256  }
 0x14f   : > { %s965_s6 = smov 8  }
 0x150   : > { %824 = dma.vmem_to_hbm [thread:$0]  (%p1021_p4), %s1236_s8, 2560, %s1234_s18, %s1244_s12, %s963_s4, %s964_s5, %s965_s6  }
 0x151 PF: > { %p830_p2 = scmp.ge.s32.totalorder %s960_s14, 2  ;;  %s542_s7 = sand.u32 1, %s940_s9  }
 0x152   : > { %s543_s15 = scalar_lea.sflag [#allocation3], %s542_s7 }
 0x153   : > { %p827_p3 = pnand %p830_p2, %p1028_p8 }
 0x155   : > { %935 = dma.done.wait (!%p827_p3), %s543_s15, 2560  }
 0x156   : > { %937 = vsyncadd (!%p827_p3), %s543_s15, 4294964736  ;;  %s15_s14 = sadd.s32 1, %s960_s14   ;;  %s1297_s9 = smov %s944_s10 }
 0x157   : > { %p12_p5 = scmp.ge.s32.totalorder %s15_s14, 4   ;;  %s1298_s10 = smov %s948_s11 }
 0x158   : > { %s1299_s11 = smov %s1034_s22  ;;  %s1300_s12 = smov %s956_s13 }
 0x159   : > { %s1301_s13 = smov %s1303_s17  ;;  %14 = sbr.rel (!%p12_p5) target bundleno = 4 (0x4), region = 66 }
 0x160   :  { %548 = vsyncpa [#allocation3], 1 }
 0x161   :  { %550 = vsyncpa [#allocation3 + $0x1], 1 }

</bundles_post_ra>
